<compile_context>
chip_gen: v5e
topology: v5e:2x2
jax: 0.10.0
libtpu: 0.0.40
codegen_flags: <defaults>
</compile_context>

<pallas_src>
import jax
import jax.numpy as jnp
from jax.experimental import pallas as pl
from jax.experimental.pallas import tpu as pltpu


# ----------------------------- kernel ---------------------------------------


def _scale_bias_kernel(x_ref, scale_ref, bias_ref, o_ref):
    # x_ref:     (tile_nc, tile_hw)  tile of the flattened image, NATIVE dtype
    # scale_ref: (tile_nc, 1)        per-(n,c) 1/std (f32), broadcast across lanes
    # bias_ref:  (tile_nc, 1)        per-(n,c) -mean/std (f32), broadcast across lanes
    # Cast to f32 inside the kernel so HBM reads stay narrow when the input is.
    x = x_ref[...].astype(jnp.float32)
    o_ref[...] = (x * scale_ref[...] + bias_ref[...]).astype(o_ref.dtype)


# --------------------------- tiling helpers ----------------------------------

_ROW_CAP = 512              # cap on rows per block
_BLOCK_BYTE_CAP = 4 << 20   # ~4 MiB (in+out) per block: already at the BW plateau
_MIN_BLOCK_BYTES = 1 << 20  # don't shrink below ~1 MiB when splitting for multi-core


def _round_up(x, m):
    return -(-x // m) * m


def _round_down(x, m):
    return (x // m) * m


def _vmem_capacity_bytes():
    try:
        return int(pltpu.get_tpu_info().vmem_capacity_bytes)
    except Exception:
        # Conservative fallback: v7x has 64 MiB of VMEM per TensorCore.
        return 64 * 1024 * 1024


def _num_tensorcores():
    """Best-effort TensorCore count per chip (v7x: 2, v5e/v6e: 1)."""
    try:
        info = pltpu.get_tpu_info()
        for attr in ("num_cores", "core_count", "num_tensorcores", "tensorcore_count"):
            v = getattr(info, attr, None)
            if v:
                return int(v)
    except Exception:
        pass
    try:
        dev = jax.devices()[0]
        for attr in ("num_cores", "core_count"):
            v = getattr(dev, attr, None)
            if v:
                return int(v)
    except Exception:
        pass
    return 1


def _sublane_multiple(dtype):
    # Sub-32-bit dtypes pack along sublanes: f32 -> 8, bf16 -> 16, (u)int8 -> 32.
    return max(8, 32 // jnp.dtype(dtype).itemsize)


def _pick_tiles(nc, hw, in_itemsize, out_itemsize, sublane_mult, num_cores):
    """Lane-/sublane-aligned tiles sized for the HBM-bandwidth roofline."""
    per_elem_bytes = in_itemsize + out_itemsize

    # Rows: keep all NC resident when modest (full dim is always layout-legal);
    # otherwise tile in multiples of the packed-sublane requirement.
    if nc <= _ROW_CAP:
        tile_nc = nc
    else:
        tile_nc = _round_down(_ROW_CAP, sublane_mult)

    # Columns: lane-aligned (multiple of 128), block bytes capped ~4 MiB.
    if hw <= 128:
        tile_hw = hw                      # full dim: legal even when < 128
    else:
        max_cols = max(128, _round_down(_BLOCK_BYTE_CAP // (per_elem_bytes * tile_nc), 128))
        tile_hw = min(max_cols, _round_up(hw, 128))

    # Multi-TensorCore chips only (v7x): target >= 4 grid steps per core so each
    # core's pipeline still double-buffers; keep blocks >= ~1 MiB.  Single-core
    # chips (v5e/v6e) skip this entirely (splitting a single-block problem just
    # adds grid-step overhead).
    if num_cores > 1:
        target_steps = 4 * num_cores

        def steps(t_nc, t_hw):
            return pl.cdiv(nc, t_nc) * pl.cdiv(hw, t_hw)

        while steps(tile_nc, tile_hw) < target_steps:
            if per_elem_bytes * tile_nc * tile_hw < 2 * _MIN_BLOCK_BYTES:
                break
            if tile_hw > 128 and tile_hw % 256 == 0:
                tile_hw //= 2
            elif tile_nc > sublane_mult and tile_nc % (2 * sublane_mult) == 0:
                tile_nc //= 2
            else:
                break

    return tile_nc, tile_hw


# ----------------------------- wrapper ---------------------------------------


def normalize_nchw_pallas(x, mean, std, *, out_dtype=None, alias_input=False):
    """out[n,c,h,w] = (x[n,c,h,w] - mean[c]) / std[c], computed in Pallas.

    out_dtype defaults to x.dtype for floating inputs (narrow in -> narrow out)
    and float32 for integer image inputs.  alias_input=True reuses the input
    HBM buffer for the output when dtypes match (no copy saved, just memory).
    """
    N, C, H, W = x.shape
    HW = H * W
    NC = N * C

    if out_dtype is None:
        out_dtype = x.dtype if jnp.issubdtype(x.dtype, jnp.floating) else jnp.float32
    out_dtype = jnp.dtype(out_dtype)

    x2 = x.reshape(NC, HW)                       # native dtype; cast is in-kernel
    scale_c = (1.0 / std).astype(jnp.float32)
    bias_c = (-mean / std).astype(jnp.float32)
    scale2 = jnp.tile(scale_c, N).reshape(NC, 1)
    bias2 = jnp.tile(bias_c, N).reshape(NC, 1)

    in_itemsize = jnp.dtype(x.dtype).itemsize
    out_itemsize = out_dtype.itemsize
    sublane_mult = max(_sublane_multiple(x.dtype), _sublane_multiple(out_dtype))
    num_cores = _num_tensorcores()

    tile_nc, tile_hw = _pick_tiles(NC, HW, in_itemsize, out_itemsize,
                                   sublane_mult, num_cores)
    grid = (pl.cdiv(NC, tile_nc), pl.cdiv(HW, tile_hw))

    # Scoped-VMEM limit = actual double-buffered block usage + margin; avoids
    # over-reserving VMEM that XLA could hand to neighboring fusions.
    vmem_cap = _vmem_capacity_bytes()
    sb_bytes = 2 * 4 * tile_nc                               # scale + bias f32 blocks
    vmem_need = 2 * (tile_nc * tile_hw * (in_itemsize + out_itemsize) + sb_bytes)
    vmem_limit = int(min(max(vmem_need + (2 << 20), 8 << 20), vmem_cap // 2))

    cost = pl.CostEstimate(
        flops=2 * NC * HW,
        transcendentals=0,
        bytes_accessed=(in_itemsize + out_itemsize) * NC * HW + 2 * 4 * NC,
    )

    alias = {}
    if alias_input and out_dtype == x2.dtype:
        alias = {0: 0}

    out2 = pl.pallas_call(
        _scale_bias_kernel,
        out_shape=jax.ShapeDtypeStruct((NC, HW), out_dtype),
        grid_spec=pl.GridSpec(
            grid=grid,
            # Grid order (rows outer, columns inner): the (tile_nc, 1) scale/bias
            # blocks have index_map constant in j, so they're DMA'd once per row
            # block (revisit caching).  Do NOT reorder the grid axes.
            in_specs=[
                pl.BlockSpec((tile_nc, tile_hw), lambda i, j: (i, j)),
                pl.BlockSpec((tile_nc, 1), lambda i, j: (i, 0)),
                pl.BlockSpec((tile_nc, 1), lambda i, j: (i, 0)),
            ],
            out_specs=pl.BlockSpec((tile_nc, tile_hw), lambda i, j: (i, j)),
        ),
        compiler_params=pltpu.CompilerParams(
            dimension_semantics=("parallel", "parallel"),
            vmem_limit_bytes=vmem_limit,
        ),
        cost_estimate=cost,
        input_output_aliases=alias,
    )(x2, scale2, bias2)

    return out2.reshape(N, C, H, W)


# ----------------------------- module ----------------------------------------


class ProcessingTracedModule:
    """JAX analogue of the PyTorch wrapper: forward(*args) = func_obj(*args)."""

    # TODO(synk): ONNX export machinery (_export_f, register_customops, torch.jit
    # scripting) has no Pallas equivalent; only forward-pass semantics are kept.

    def __init__(self, func_obj=None):
        self.func_obj = func_obj

    def __call__(self, *args):
        assert self.func_obj is not None, 'No forward method found.'
        return self.func_obj(*args)


if __name__ == "__main__":
    key = jax.random.PRNGKey(0)
    N, C, H, W = 2, 4, 16, 16
    x = jax.random.normal(key, (N, C, H, W), dtype=jnp.float32)

    # Deterministic per-channel normalization parameters (no checkpoint load).
    mean = jnp.array([0.485, 0.456, 0.406, 0.5], dtype=jnp.float32)
    std = jnp.array([0.229, 0.224, 0.225, 0.25], dtype=jnp.float32)

    module = ProcessingTracedModule(
        func_obj=lambda inp: normalize_nchw_pallas(inp, mean, std)
    )

    out = module(x)
    out = jax.block_until_ready(out)

    # Sanity check against plain-JAX reference (broadcast exactly like PyTorch NCHW).
    ref = (x - mean.reshape(1, C, 1, 1)) / std.reshape(1, C, 1, 1)
    assert out.shape == (N, C, H, W) and out.dtype == jnp.float32
    assert jnp.allclose(out, ref, atol=1e-4, rtol=1e-5)

    print("KERNEL_OK")
</pallas_src>

<mosaic_0001>
module attributes {stable_mosaic.version = 11 : i64} {
  func.func @_scale_bias_kernel(%arg0: i32, %arg1: i32, %arg2: memref<8x256xf32, #tpu.memory_space<vmem>>, %arg3: memref<8x1xf32, #tpu.memory_space<vmem>>, %arg4: memref<8x1xf32, #tpu.memory_space<vmem>>, %arg5: memref<8x256xf32, #tpu.memory_space<vmem>>) attributes {dimension_semantics = [#tpu.dimension_semantics<parallel>, #tpu.dimension_semantics<parallel>], iteration_bounds = array<i64: 1, 1>, scalar_prefetch = 0 : i64, scratch_operands = 0 : i64, tpu.core_type = #tpu.core_type<tc>, window_params = [{transform_indices = @transform_0, window_bounds = array<i64: 8, 256>}, {transform_indices = @transform_1, window_bounds = array<i64: 8, 1>}, {transform_indices = @transform_2, window_bounds = array<i64: 8, 1>}, {transform_indices = @transform_3, window_bounds = array<i64: 8, 256>}]} {
    %c0 = arith.constant 0 : index
    %c0_0 = arith.constant 0 : index
    %0 = vector.load %arg2[%c0, %c0_0] : memref<8x256xf32, #tpu.memory_space<vmem>>, vector<8x256xf32>
    %c0_1 = arith.constant 0 : index
    %c0_2 = arith.constant 0 : index
    %1 = vector.load %arg3[%c0_1, %c0_2] : memref<8x1xf32, #tpu.memory_space<vmem>>, vector<8x1xf32>
    %2 = vector.broadcast %1 : vector<8x1xf32> to vector<8x256xf32>
    %3 = arith.mulf %0, %2 : vector<8x256xf32>
    %c0_3 = arith.constant 0 : index
    %c0_4 = arith.constant 0 : index
    %4 = vector.load %arg4[%c0_3, %c0_4] : memref<8x1xf32, #tpu.memory_space<vmem>>, vector<8x1xf32>
    %5 = vector.broadcast %4 : vector<8x1xf32> to vector<8x256xf32>
    %6 = arith.addf %3, %5 : vector<8x256xf32>
    %c0_5 = arith.constant 0 : index
    %c0_6 = arith.constant 0 : index
    %7 = vector.load %arg5[%c0_5, %c0_6] : memref<8x256xf32, #tpu.memory_space<vmem>>, vector<8x256xf32>
    tpu.vector_store %arg5[%c0_5, %c0_6], %6 {strides = array<i32>} : memref<8x256xf32, #tpu.memory_space<vmem>>, vector<8x256xf32>,
    return
  }
  func.func @transform_0(%arg0: i32, %arg1: i32) -> (i32, i32) {
    %c0_i32 = arith.constant 0 : i32
    return %arg0, %arg1 : i32, i32
  }
  func.func @transform_1(%arg0: i32, %arg1: i32) -> (i32, i32) {
    %c0_i32 = arith.constant 0 : i32
    %c0_i32_0 = arith.constant 0 : i32
    return %arg0, %c0_i32 : i32, i32
  }
  func.func @transform_2(%arg0: i32, %arg1: i32) -> (i32, i32) {
    %c0_i32 = arith.constant 0 : i32
    %c0_i32_0 = arith.constant 0 : i32
    return %arg0, %c0_i32 : i32, i32
  }
  func.func @transform_3(%arg0: i32, %arg1: i32) -> (i32, i32) {
    %c0_i32 = arith.constant 0 : i32
    return %arg0, %arg1 : i32, i32
  }
}

</mosaic_0001>

<bundles_post_ra>
// kernel: tpu_custom_call.1
= control target key start
LH: loop header
LB: loop body
LE: loop exit
PB: predicated region body
PF: predicated region fallthrough
CT: control target
= control target key end

     0   :  { %s117_s0 = inlined_call_operand.vmem [shape: f32[8,256], index: 0, kind: input, shape index: {}]   ;;  %s118_s1 = inlined_call_operand.vmem [shape: f32[8,1], index: 1, kind: input, shape index: {}]   ;;  %s119_s2 = inlined_call_operand.vmem [shape: f32[8,1], index: 2, kind: input, shape index: {}]   ;;  %s120_s3 = inlined_call_operand.hbm [shape: f32[8,256], index: 3, kind: output, shape index: {}]  }
   0x1   :  { %v17_v0 = vld [vmem:[%s118_s1] sm:$0xff] }
   0x2   :  { %8 = vsyncpa [#allocation3], 0  ;;  %v80_v1 = vmov 0   ;;  %v25_v2 = vld [vmem:[%s119_s2] sm:$0xff]  ;;  %v16_v5 = vld [vmem:[%s117_s0 + $0x8] sm:$0xff]  ;;  %s81_s1 = smov [#allocation2]  }
   0x3   :  { %53 = vset.pattern.permute.xlu0 %v80_v1  ;;  %v15_v4 = vld [vmem:[%s117_s0] sm:$0xff]  ;;  %s40_s20 = sshll.u32 %s81_s1, 4  ;;  %s42_s23 = sshll.u32 %s120_s3, 4  ;;  %s41_s20 = int_to_ptr.vmem [resolvable:$true] %s40_s20  ;;  %s43_s23 = int_to_ptr.hbm [resolvable:$true] %s42_s23 }
   0x4   :  { %20 = vperm.xlu0 %53, %v17_v0  }
   0xc   :  { %28 = vperm.xlu0 %53, %v25_v2  }
  0x76   :  { %v21_v3 = vpop.permute.xlu0 %20 }
  0x77   :  { %v23_v6 = vmul.f32 %v21_v3, %v15_v4  ;;  %v24_v7 = vmul.f32 %v21_v3, %v16_v5 }
  0x7e   :  { %v29_v8 = vpop.permute.xlu0 %28 }
  0x7f   :  { %v31_v9 = vadd.f32 %v29_v8, %v23_v6  ;;  %v32_v10 = vadd.f32 %v29_v8, %v24_v7 }
  0x81   :  { %33 = vst [vmem:[#allocation2] sm:$0xff] %v31_v9 }
  0x82   :  { %34 = vst [vmem:[#allocation2 + $0x8] sm:$0xff] %v32_v10 }
  0x83   :  { %45 = dma.vmem_to_hbm [thread:$0]  %s41_s20, 256, %s43_s23, [#allocation3]  }
  0x84   :  { %78 = dma.done.wait [#allocation3], 256  }
  0x85   :  { %79 = vsyncadd [#allocation3], 4294967040 }
  0x86   :  { %50 = vsyncpa [#allocation3], 1 }

</bundles_post_ra>
